<compile_context>
chip_gen: v5e
topology: v5e:2x2
jax: 0.10.0
libtpu: 0.0.40
codegen_flags: <defaults>
</compile_context>

<pallas_src>
import functools

import numpy as np
import jax
import jax.numpy as jnp
from jax import lax
from jax.experimental import pallas as pl
from jax.experimental.pallas import tpu as pltpu


def _inverted_residual_kernel(x_ref, m_ref, *refs, W, W2, stride, expand,
                              use_res, tap_dtype):
    """One batch element, planar layout (channels on sublanes, spatial on lanes).

    stride==1: x_ref is (Cin, H*W); taps are full-res lane rolls.
    stride==2: x_ref is (4, Cin, (H/2)*(W/2)) polyphase planes, plane
               p = 2*ph + pw holds x[:, 2i+ph, 2j+pw].  Each 3x3 tap of the
               stride-2 depthwise reads exactly one plane shifted by 0/-1
               rows/cols, so everything after the expand conv runs at 1/4 res.
    """
    if expand:
        (w1_ref, b1_ref, wdw_ref, b2_ref, w3_ref, b3_ref, o_ref) = refs

        def expand_1x1(xin):   # 1x1 conv (BN scale pre-folded) + bias + ReLU6
            t = jnp.dot(w1_ref[...], xin.astype(jnp.bfloat16),
                        preferred_element_type=jnp.float32)
            return jnp.clip(t + b1_ref[...], 0.0, 6.0)
    else:
        (wdw_ref, b2_ref, w3_ref, b3_ref, o_ref) = refs

        def expand_1x1(xin):   # hidden == Cin, no expand conv
            return xin

    S = x_ref.shape[-1]        # lane extent the taps operate on

    if stride == 1:
        x = x_ref[...]                                     # (Cin, HW) f32
        tq = expand_1x1(x).astype(tap_dtype)

        # 3x3 depthwise, zero padding 1.  Shifted views are XLU lane rolls of
        # the flattened spatial axis; out-of-image taps are zeroed with
        # precomputed per-tap masks.  (Mask is a 0/1 multiply; a non-finite
        # out-of-image value would propagate as NaN — inputs assumed finite.)
        def tap(dh, dw):
            k = (dh + 1) * 3 + (dw + 1)
            off = dh * W + dw
            v = tq if off == 0 else pltpu.roll(tq, shift=(-off) % S, axis=1)
            v = v * wdw_ref[:, k:k + 1]                    # folded per-chan tap
            if off != 0:
                v = v * m_ref[k:k + 1, :]
            return v
    else:
        t_ph = [expand_1x1(x_ref[p]).astype(tap_dtype) for p in range(4)]

        def tap(dh, dw):
            k = (dh + 1) * 3 + (dw + 1)
            ph = 0 if dh == 0 else 1
            pw = 0 if dw == 0 else 1
            si = -1 if dh == -1 else 0
            sj = -1 if dw == -1 else 0
            off = si * W2 + sj                             # in {0,-1,-W2,-W2-1}
            v = t_ph[2 * ph + pw]
            if off != 0:
                v = pltpu.roll(v, shift=(-off) % S, axis=1)
            v = v * wdw_ref[:, k:k + 1]
            if off != 0:
                v = v * m_ref[k:k + 1, :]
            return v

    acc = tap(0, 0).astype(jnp.float32)                    # f32 accumulator
    for dh in (-1, 0, 1):
        for dw in (-1, 0, 1):
            if (dh, dw) != (0, 0):
                acc = acc + tap(dh, dw)
    d = jnp.clip(acc + b2_ref[...], 0.0, 6.0)

    # 1x1 projection conv (BN scale pre-folded), MXU: bf16 in / f32 acc.
    y = jnp.dot(w3_ref[...], d.astype(jnp.bfloat16),
                preferred_element_type=jnp.float32)
    y = y + b3_ref[...]
    if use_res:                                            # stride==1, inp==oup
        y = y + x
    o_ref[...] = y


def _tap_masks_full(H, W):
    """(9, H*W): 1 where input position (h+dh, w+dw) is inside the image."""
    h = np.arange(H)[:, None]
    w = np.arange(W)[None, :]
    rows = []
    for dh in (-1, 0, 1):
        for dw in (-1, 0, 1):
            ok = (h + dh >= 0) & (h + dh < H) & (w + dw >= 0) & (w + dw < W)
            rows.append(ok.reshape(-1))
    return np.stack(rows).astype(np.float32)


def _tap_masks_polyphase(H2, W2):
    """(9, H2*W2): 1 where the polyphase tap source (i+si, j+sj) exists."""
    i = np.arange(H2)[:, None]
    j = np.arange(W2)[None, :]
    rows = []
    for dh in (-1, 0, 1):
        for dw in (-1, 0, 1):
            si = -1 if dh == -1 else 0
            sj = -1 if dw == -1 else 0
            ok = (i + si >= 0) & (j + sj >= 0)
            rows.append(ok.reshape(-1))
    return np.stack(rows).astype(np.float32)


def _tap_dtype():
    """bf16 tap arithmetic on chips with a bf16 VALU (v6e / v7x); f32 on v5e."""
    try:
        kind = jax.devices()[0].device_kind.lower()
    except Exception:
        return jnp.float32
    return jnp.bfloat16 if ('v6' in kind or 'v7' in kind) else jnp.float32


def _vmem_limit_bytes():
    try:
        kind = jax.devices()[0].device_kind.lower()
    except Exception:
        return 32 * 1024 * 1024
    if 'v7' in kind:
        return 40 * 1024 * 1024    # 64 MiB physical per TC -> leave headroom
    return 64 * 1024 * 1024        # v5e / v6e: 128 MiB physical


def inverted_residual(x_nchw, params, *, stride, expand_ratio, tap_dtype=None):
    """x_nchw: (N, Cin, H, W) float32 -> (N, oup, Hout, Wout) float32."""
    assert stride in (1, 2)
    N, Cin, H, W = x_nchw.shape
    expand = expand_ratio != 1
    hidden = params['wdw'].shape[0]
    oup = params['w3'].shape[0]
    use_res = (stride == 1) and (Cin == oup)
    if tap_dtype is None:
        tap_dtype = _tap_dtype()

    # --- fold eval-mode BN scales into the conv weights (in f32, then cast) ---
    wdw_f = (params['wdw'] * params['s2'][:, None, None]).reshape(hidden, 9)
    w3_f = (params['w3'] * params['s3'][:, None]).astype(jnp.bfloat16)
    if expand:
        w1_f = (params['w1'] * params['s1'][:, None]).astype(jnp.bfloat16)

    if stride == 1:
        S = H * W
        x = x_nchw.reshape(N, Cin, S).astype(jnp.float32)
        masks = _tap_masks_full(H, W)
        x_spec = pl.BlockSpec((None, Cin, S), lambda n: (n, 0, 0))
        Hout, Wout = H, W
    else:
        assert H % 2 == 0 and W % 2 == 0
        H2, W2 = H // 2, W // 2
        S = H2 * W2
        # Polyphase split (the pointwise 1x1 commutes with it):
        # plane p = 2*ph + pw holds x[:, :, 2i+ph, 2j+pw].
        x = x_nchw.reshape(N, Cin, H2, 2, W2, 2).transpose(0, 3, 5, 1, 2, 4)
        x = x.reshape(N, 4, Cin, S).astype(jnp.float32)
        masks = _tap_masks_polyphase(H2, W2)
        x_spec = pl.BlockSpec((None, 4, Cin, S), lambda n: (n, 0, 0, 0))
        Hout, Wout = H2, W2

    def col(v):  # per-channel bias -> (C, 1) for lane-broadcast in the kernel
        return v.reshape(-1, 1).astype(jnp.float32)

    args, specs = [x], [x_spec]

    def add_full(a):  # small resident 2-D tensor, same block every grid step
        assert a.ndim == 2
        args.append(a)
        specs.append(pl.BlockSpec(a.shape, lambda n: (0, 0)))

    add_full(jnp.asarray(masks, dtype=tap_dtype))
    if expand:                     # w1/b1 not passed at all when expand_ratio==1
        add_full(w1_f)
        add_full(col(params['b1']))
    add_full(wdw_f.astype(tap_dtype))
    add_full(col(params['b2']))
    add_full(w3_f)
    add_full(col(params['b3']))

    kernel = functools.partial(
        _inverted_residual_kernel, W=W, W2=W // 2, stride=stride,
        expand=expand, use_res=use_res, tap_dtype=tap_dtype)

    # TODO(synk): for large feature maps on v7x (64 MiB VMEM, 2 TCs) add a
    # haloed spatial row-tile grid axis marked "parallel"; for late stages
    # where H*W is not a multiple of 128, pack several batch elements per grid
    # step so the output stays lane-dense.
    out = pl.pallas_call(
        kernel,
        out_shape=jax.ShapeDtypeStruct((N, oup, Hout * Wout), jnp.float32),
        grid=(N,),
        in_specs=specs,
        out_specs=pl.BlockSpec((None, oup, Hout * Wout), lambda n: (n, 0, 0)),
        compiler_params=pltpu.CompilerParams(
            dimension_semantics=("parallel",),
            vmem_limit_bytes=_vmem_limit_bytes()),
    )(*args)

    return out.reshape(N, oup, Hout, Wout)


def make_params(key, inp, oup, expand_ratio):
    """Deterministic synthetic parameters; BN folded into (scale, bias)."""
    hidden = int(round(inp * expand_ratio))
    ks = jax.random.split(key, 16)
    eps = 1e-5

    def bn_fold(kg, kb, km, kv, c):
        gamma = 1.0 + 0.1 * jax.random.normal(kg, (c,), jnp.float32)
        beta = 0.1 * jax.random.normal(kb, (c,), jnp.float32)
        mean = 0.1 * jax.random.normal(km, (c,), jnp.float32)
        var = 1.0 + 0.1 * jnp.abs(jax.random.normal(kv, (c,), jnp.float32))
        scale = gamma / jnp.sqrt(var + eps)
        return scale, beta - mean * scale

    p = {}
    if expand_ratio != 1:
        # PyTorch 1x1 conv weight (hidden, inp, 1, 1) -> (hidden, inp)
        p['w1'] = 0.1 * jax.random.normal(ks[0], (hidden, inp), jnp.float32)
        p['s1'], p['b1'] = bn_fold(ks[3], ks[4], ks[5], ks[6], hidden)
    # depthwise weight (hidden, 1, 3, 3) -> (hidden, 3, 3)
    p['wdw'] = 0.1 * jax.random.normal(ks[1], (hidden, 3, 3), jnp.float32)
    # projection weight (oup, hidden, 1, 1) -> (oup, hidden)
    p['w3'] = 0.1 * jax.random.normal(ks[2], (oup, hidden), jnp.float32)
    p['s2'], p['b2'] = bn_fold(ks[7], ks[8], ks[9], ks[10], hidden)
    p['s3'], p['b3'] = bn_fold(ks[11], ks[12], ks[13], ks[14], oup)
    return p


def reference_forward(x, params, *, stride, expand_ratio,
                      mm_dtype=jnp.float32, tap_dtype=jnp.float32):
    """Pure-JAX NCHW reference.  mm_dtype / tap_dtype select the input dtype of
    the 1x1 matmuls / depthwise tap products (bf16 reproduces the kernel math;
    f32 = exact module).  BN scales are folded into weights like the kernel."""
    p = params
    N, Cin, H, W = x.shape
    hidden = p['wdw'].shape[0]
    oup = p['w3'].shape[0]
    hp = lax.Precision.HIGHEST

    def bias(v, b):
        return v + b.reshape(1, -1, 1, 1)

    t = x
    if expand_ratio != 1:
        w1 = (p['w1'] * p['s1'][:, None]).astype(mm_dtype)
        t = jnp.einsum('dc,nchw->ndhw', w1, x.astype(mm_dtype),
                       preferred_element_type=jnp.float32, precision=hp)
        t = jnp.clip(bias(t, p['b1']), 0.0, 6.0)

    wdw = (p['wdw'] * p['s2'][:, None, None]).astype(tap_dtype)
    tq = t.astype(tap_dtype)
    tpad = jnp.pad(tq, ((0, 0), (0, 0), (1, 1), (1, 1)))
    acc = jnp.zeros((N, hidden, H, W), jnp.float32)
    for dh in (-1, 0, 1):
        for dw in (-1, 0, 1):
            patch = tpad[:, :, 1 + dh:1 + dh + H, 1 + dw:1 + dw + W]
            wk = wdw[:, dh + 1, dw + 1].reshape(1, hidden, 1, 1)
            acc = acc + (patch * wk).astype(jnp.float32)
    if stride == 2:
        acc = acc[:, :, ::2, ::2]
    d = jnp.clip(bias(acc, p['b2']), 0.0, 6.0)

    w3 = (p['w3'] * p['s3'][:, None]).astype(mm_dtype)
    y = jnp.einsum('dc,nchw->ndhw', w3, d.astype(mm_dtype),
                   preferred_element_type=jnp.float32, precision=hp)
    y = bias(y, p['b3'])

    if stride == 1 and Cin == oup:
        y = y + x
    return y


if __name__ == "__main__":
    key = jax.random.PRNGKey(0)
    tap_dtype = _tap_dtype()

    configs = [
        # (N, inp, oup, H, W, stride, expand_ratio)
        (2, 8, 8, 16, 16, 1, 4),     # residual branch (stride 1, inp == oup)
        (2, 8, 16, 32, 32, 2, 4),    # stride-2, channel-expanding block
        (2, 8, 8, 16, 16, 1, 1),     # expand_ratio == 1 branch
        (2, 16, 24, 32, 32, 2, 1),   # stride-2 + expand_ratio == 1
    ]
    for (N, inp, oup, H, W, stride, er) in configs:
        key, kx, kp = jax.random.split(key, 3)
        x = jax.random.normal(kx, (N, inp, H, W), jnp.float32)
        params = make_params(kp, inp, oup, er)

        out = jax.block_until_ready(
            inverted_residual(x, params, stride=stride, expand_ratio=er,
                              tap_dtype=tap_dtype))

        ref_matched = reference_forward(x, params, stride=stride,
                                        expand_ratio=er,
                                        mm_dtype=jnp.bfloat16,
                                        tap_dtype=tap_dtype)
        ref_f32 = reference_forward(x, params, stride=stride, expand_ratio=er)

        assert out.shape == ref_f32.shape, (out.shape, ref_f32.shape)
        err_m = float(jnp.max(jnp.abs(out - ref_matched)))
        assert jnp.allclose(out, ref_matched, atol=2e-3, rtol=2e-3), err_m
        err_f = float(jnp.max(jnp.abs(out - ref_f32)))
        assert jnp.allclose(out, ref_f32, atol=8e-2, rtol=8e-2), err_f

    print("KERNEL_OK")
</pallas_src>

<mosaic_0001>
module attributes {stable_mosaic.version = 11 : i64} {
  func.func @_inverted_residual_kernel(%arg0: i32, %arg1: memref<1x8x256xf32, #tpu.memory_space<vmem>>, %arg2: memref<9x256xf32, #tpu.memory_space<vmem>>, %arg3: memref<32x8xbf16, #tpu.memory_space<vmem>>, %arg4: memref<32x1xf32, #tpu.memory_space<vmem>>, %arg5: memref<32x9xf32, #tpu.memory_space<vmem>>, %arg6: memref<32x1xf32, #tpu.memory_space<vmem>>, %arg7: memref<8x32xbf16, #tpu.memory_space<vmem>>, %arg8: memref<8x1xf32, #tpu.memory_space<vmem>>, %arg9: memref<1x8x256xf32, #tpu.memory_space<vmem>>) attributes {dimension_semantics = [#tpu.dimension_semantics<parallel>], iteration_bounds = array<i64: 2>, scalar_prefetch = 0 : i64, scratch_operands = 0 : i64, tpu.core_type = #tpu.core_type<tc>, window_params = [{transform_indices = @transform_0, window_bounds = array<i64: 1, 8, 256>}, {pipeline_mode = #tpu.pipeline_mode<synchronous>, transform_indices = @transform_1, window_bounds = array<i64: 9, 256>}, {pipeline_mode = #tpu.pipeline_mode<synchronous>, transform_indices = @transform_2, window_bounds = array<i64: 32, 8>}, {pipeline_mode = #tpu.pipeline_mode<synchronous>, transform_indices = @transform_3, window_bounds = array<i64: 32, 1>}, {pipeline_mode = #tpu.pipeline_mode<synchronous>, transform_indices = @transform_4, window_bounds = array<i64: 32, 9>}, {pipeline_mode = #tpu.pipeline_mode<synchronous>, transform_indices = @transform_5, window_bounds = array<i64: 32, 1>}, {pipeline_mode = #tpu.pipeline_mode<synchronous>, transform_indices = @transform_6, window_bounds = array<i64: 8, 32>}, {pipeline_mode = #tpu.pipeline_mode<synchronous>, transform_indices = @transform_7, window_bounds = array<i64: 8, 1>}, {transform_indices = @transform_8, window_bounds = array<i64: 1, 8, 256>}]} {
    %c0 = arith.constant 0 : index
    %c0_0 = arith.constant 0 : index
    %c0_1 = arith.constant 0 : index
    %0 = vector.load %arg1[%c0, %c0_0, %c0_1] : memref<1x8x256xf32, #tpu.memory_space<vmem>>, vector<1x8x256xf32>
    %1 = vector.shape_cast %0 : vector<1x8x256xf32> to vector<8x256xf32>
    %c0_2 = arith.constant 0 : index
    %c0_3 = arith.constant 0 : index
    %2 = vector.load %arg3[%c0_2, %c0_3] : memref<32x8xbf16, #tpu.memory_space<vmem>>, vector<32x8xbf16>
    %3 = arith.truncf %1 : vector<8x256xf32> to vector<8x256xbf16>
    %cst = arith.constant dense<0.000000e+00> : vector<32x256xf32>
    %4 = tpu.matmul %2, %3, %cst {dimension_numbers = #tpu.dot_dimension_numbers<[1], [0], [0], [1], [0, 0, 1, 1], [], []>} : vector<32x8xbf16>, vector<8x256xbf16>, vector<32x256xf32> -> vector<32x256xf32>
    %c0_4 = arith.constant 0 : index
    %c0_5 = arith.constant 0 : index
    %5 = vector.load %arg4[%c0_4, %c0_5] : memref<32x1xf32, #tpu.memory_space<vmem>>, vector<32x1xf32>
    %6 = vector.broadcast %5 : vector<32x1xf32> to vector<32x256xf32>
    %7 = arith.addf %4, %6 : vector<32x256xf32>
    %cst_6 = arith.constant 0.000000e+00 : f32
    %cst_7 = arith.constant 6.000000e+00 : f32
    %8 = vector.broadcast %cst_6 : f32 to vector<32x256xf32>
    %9 = arith.maximumf %8, %7 : vector<32x256xf32>
    %10 = vector.broadcast %cst_7 : f32 to vector<32x256xf32>
    %11 = arith.minimumf %10, %9 : vector<32x256xf32>
    %c0_8 = arith.constant 0 : index
    %c4 = arith.constant 4 : index
    %12 = vector.load %arg5[%c0_8, %c4] : memref<32x9xf32, #tpu.memory_space<vmem>>, vector<32x1xf32>
    %13 = vector.broadcast %12 : vector<32x1xf32> to vector<32x256xf32>
    %14 = arith.mulf %11, %13 : vector<32x256xf32>
    %c17_i32 = arith.constant 17 : i32
    %15 = tpu.dynamic_rotate %11 by %c17_i32 dim 1 : vector<32x256xf32>, i32 -> vector<32x256xf32>
    %c0_9 = arith.constant 0 : index
    %c0_10 = arith.constant 0 : index
    %16 = vector.load %arg5[%c0_9, %c0_10] : memref<32x9xf32, #tpu.memory_space<vmem>>, vector<32x1xf32>
    %17 = vector.broadcast %16 : vector<32x1xf32> to vector<32x256xf32>
    %18 = arith.mulf %15, %17 : vector<32x256xf32>
    %c0_11 = arith.constant 0 : index
    %c0_12 = arith.constant 0 : index
    %19 = vector.load %arg2[%c0_11, %c0_12] : memref<9x256xf32, #tpu.memory_space<vmem>>, vector<1x256xf32>
    %20 = vector.broadcast %19 : vector<1x256xf32> to vector<32x256xf32>
    %21 = arith.mulf %18, %20 : vector<32x256xf32>
    %22 = arith.addf %14, %21 : vector<32x256xf32>
    %c16_i32 = arith.constant 16 : i32
    %23 = tpu.dynamic_rotate %11 by %c16_i32 dim 1 : vector<32x256xf32>, i32 -> vector<32x256xf32>
    %c0_13 = arith.constant 0 : index
    %c1 = arith.constant 1 : index
    %24 = vector.load %arg5[%c0_13, %c1] : memref<32x9xf32, #tpu.memory_space<vmem>>, vector<32x1xf32>
    %25 = vector.broadcast %24 : vector<32x1xf32> to vector<32x256xf32>
    %26 = arith.mulf %23, %25 : vector<32x256xf32>
    %c1_14 = arith.constant 1 : index
    %c0_15 = arith.constant 0 : index
    %27 = vector.load %arg2[%c1_14, %c0_15] : memref<9x256xf32, #tpu.memory_space<vmem>>, vector<1x256xf32>
    %28 = vector.broadcast %27 : vector<1x256xf32> to vector<32x256xf32>
    %29 = arith.mulf %26, %28 : vector<32x256xf32>
    %30 = arith.addf %22, %29 : vector<32x256xf32>
    %c15_i32 = arith.constant 15 : i32
    %31 = tpu.dynamic_rotate %11 by %c15_i32 dim 1 : vector<32x256xf32>, i32 -> vector<32x256xf32>
    %c0_16 = arith.constant 0 : index
    %c2 = arith.constant 2 : index
    %32 = vector.load %arg5[%c0_16, %c2] : memref<32x9xf32, #tpu.memory_space<vmem>>, vector<32x1xf32>
    %33 = vector.broadcast %32 : vector<32x1xf32> to vector<32x256xf32>
    %34 = arith.mulf %31, %33 : vector<32x256xf32>
    %c2_17 = arith.constant 2 : index
    %c0_18 = arith.constant 0 : index
    %35 = vector.load %arg2[%c2_17, %c0_18] : memref<9x256xf32, #tpu.memory_space<vmem>>, vector<1x256xf32>
    %36 = vector.broadcast %35 : vector<1x256xf32> to vector<32x256xf32>
    %37 = arith.mulf %34, %36 : vector<32x256xf32>
    %38 = arith.addf %30, %37 : vector<32x256xf32>
    %c1_i32 = arith.constant 1 : i32
    %39 = tpu.dynamic_rotate %11 by %c1_i32 dim 1 : vector<32x256xf32>, i32 -> vector<32x256xf32>
    %c0_19 = arith.constant 0 : index
    %c3 = arith.constant 3 : index
    %40 = vector.load %arg5[%c0_19, %c3] : memref<32x9xf32, #tpu.memory_space<vmem>>, vector<32x1xf32>
    %41 = vector.broadcast %40 : vector<32x1xf32> to vector<32x256xf32>
    %42 = arith.mulf %39, %41 : vector<32x256xf32>
    %c3_20 = arith.constant 3 : index
    %c0_21 = arith.constant 0 : index
    %43 = vector.load %arg2[%c3_20, %c0_21] : memref<9x256xf32, #tpu.memory_space<vmem>>, vector<1x256xf32>
    %44 = vector.broadcast %43 : vector<1x256xf32> to vector<32x256xf32>
    %45 = arith.mulf %42, %44 : vector<32x256xf32>
    %46 = arith.addf %38, %45 : vector<32x256xf32>
    %c255_i32 = arith.constant 255 : i32
    %47 = tpu.dynamic_rotate %11 by %c255_i32 dim 1 : vector<32x256xf32>, i32 -> vector<32x256xf32>
    %c0_22 = arith.constant 0 : index
    %c5 = arith.constant 5 : index
    %48 = vector.load %arg5[%c0_22, %c5] : memref<32x9xf32, #tpu.memory_space<vmem>>, vector<32x1xf32>
    %49 = vector.broadcast %48 : vector<32x1xf32> to vector<32x256xf32>
    %50 = arith.mulf %47, %49 : vector<32x256xf32>
    %c5_23 = arith.constant 5 : index
    %c0_24 = arith.constant 0 : index
    %51 = vector.load %arg2[%c5_23, %c0_24] : memref<9x256xf32, #tpu.memory_space<vmem>>, vector<1x256xf32>
    %52 = vector.broadcast %51 : vector<1x256xf32> to vector<32x256xf32>
    %53 = arith.mulf %50, %52 : vector<32x256xf32>
    %54 = arith.addf %46, %53 : vector<32x256xf32>
    %c241_i32 = arith.constant 241 : i32
    %55 = tpu.dynamic_rotate %11 by %c241_i32 dim 1 : vector<32x256xf32>, i32 -> vector<32x256xf32>
    %c0_25 = arith.constant 0 : index
    %c6 = arith.constant 6 : index
    %56 = vector.load %arg5[%c0_25, %c6] : memref<32x9xf32, #tpu.memory_space<vmem>>, vector<32x1xf32>
    %57 = vector.broadcast %56 : vector<32x1xf32> to vector<32x256xf32>
    %58 = arith.mulf %55, %57 : vector<32x256xf32>
    %c6_26 = arith.constant 6 : index
    %c0_27 = arith.constant 0 : index
    %59 = vector.load %arg2[%c6_26, %c0_27] : memref<9x256xf32, #tpu.memory_space<vmem>>, vector<1x256xf32>
    %60 = vector.broadcast %59 : vector<1x256xf32> to vector<32x256xf32>
    %61 = arith.mulf %58, %60 : vector<32x256xf32>
    %62 = arith.addf %54, %61 : vector<32x256xf32>
    %c240_i32 = arith.constant 240 : i32
    %63 = tpu.dynamic_rotate %11 by %c240_i32 dim 1 : vector<32x256xf32>, i32 -> vector<32x256xf32>
    %c0_28 = arith.constant 0 : index
    %c7 = arith.constant 7 : index
    %64 = vector.load %arg5[%c0_28, %c7] : memref<32x9xf32, #tpu.memory_space<vmem>>, vector<32x1xf32>
    %65 = vector.broadcast %64 : vector<32x1xf32> to vector<32x256xf32>
    %66 = arith.mulf %63, %65 : vector<32x256xf32>
    %c7_29 = arith.constant 7 : index
    %c0_30 = arith.constant 0 : index
    %67 = vector.load %arg2[%c7_29, %c0_30] : memref<9x256xf32, #tpu.memory_space<vmem>>, vector<1x256xf32>
    %68 = vector.broadcast %67 : vector<1x256xf32> to vector<32x256xf32>
    %69 = arith.mulf %66, %68 : vector<32x256xf32>
    %70 = arith.addf %62, %69 : vector<32x256xf32>
    %c239_i32 = arith.constant 239 : i32
    %71 = tpu.dynamic_rotate %11 by %c239_i32 dim 1 : vector<32x256xf32>, i32 -> vector<32x256xf32>
    %c0_31 = arith.constant 0 : index
    %c8 = arith.constant 8 : index
    %72 = vector.load %arg5[%c0_31, %c8] : memref<32x9xf32, #tpu.memory_space<vmem>>, vector<32x1xf32>
    %73 = vector.broadcast %72 : vector<32x1xf32> to vector<32x256xf32>
    %74 = arith.mulf %71, %73 : vector<32x256xf32>
    %c8_32 = arith.constant 8 : index
    %c0_33 = arith.constant 0 : index
    %75 = vector.load %arg2[%c8_32, %c0_33] : memref<9x256xf32, #tpu.memory_space<vmem>>, vector<1x256xf32>
    %76 = vector.broadcast %75 : vector<1x256xf32> to vector<32x256xf32>
    %77 = arith.mulf %74, %76 : vector<32x256xf32>
    %78 = arith.addf %70, %77 : vector<32x256xf32>
    %c0_34 = arith.constant 0 : index
    %c0_35 = arith.constant 0 : index
    %79 = vector.load %arg6[%c0_34, %c0_35] : memref<32x1xf32, #tpu.memory_space<vmem>>, vector<32x1xf32>
    %80 = vector.broadcast %79 : vector<32x1xf32> to vector<32x256xf32>
    %81 = arith.addf %78, %80 : vector<32x256xf32>
    %cst_36 = arith.constant 0.000000e+00 : f32
    %cst_37 = arith.constant 6.000000e+00 : f32
    %82 = vector.broadcast %cst_36 : f32 to vector<32x256xf32>
    %83 = arith.maximumf %82, %81 : vector<32x256xf32>
    %84 = vector.broadcast %cst_37 : f32 to vector<32x256xf32>
    %85 = arith.minimumf %84, %83 : vector<32x256xf32>
    %c0_38 = arith.constant 0 : index
    %c0_39 = arith.constant 0 : index
    %86 = vector.load %arg7[%c0_38, %c0_39] : memref<8x32xbf16, #tpu.memory_space<vmem>>, vector<8x32xbf16>
    %87 = arith.truncf %85 : vector<32x256xf32> to vector<32x256xbf16>
    %cst_40 = arith.constant dense<0.000000e+00> : vector<8x256xf32>
    %88 = tpu.matmul %86, %87, %cst_40 {dimension_numbers = #tpu.dot_dimension_numbers<[1], [0], [0], [1], [0, 0, 1, 1], [], []>} : vector<8x32xbf16>, vector<32x256xbf16>, vector<8x256xf32> -> vector<8x256xf32>
    %c0_41 = arith.constant 0 : index
    %c0_42 = arith.constant 0 : index
    %89 = vector.load %arg8[%c0_41, %c0_42] : memref<8x1xf32, #tpu.memory_space<vmem>>, vector<8x1xf32>
    %90 = vector.broadcast %89 : vector<8x1xf32> to vector<8x256xf32>
    %91 = arith.addf %88, %90 : vector<8x256xf32>
    %92 = arith.addf %91, %1 : vector<8x256xf32>
    %c0_43 = arith.constant 0 : index
    %c0_44 = arith.constant 0 : index
    %c0_45 = arith.constant 0 : index
    %93 = vector.load %arg9[%c0_43, %c0_44, %c0_45] : memref<1x8x256xf32, #tpu.memory_space<vmem>>, vector<1x8x256xf32>
    %94 = vector.shape_cast %93 : vector<1x8x256xf32> to vector<8x256xf32>
    %95 = vector.shape_cast %92 : vector<8x256xf32> to vector<1x8x256xf32>
    tpu.vector_store %arg9[%c0_43, %c0_44, %c0_45], %95 {strides = array<i32>} : memref<1x8x256xf32, #tpu.memory_space<vmem>>, vector<1x8x256xf32>,
    return
  }
  func.func @transform_0(%arg0: i32) -> (i32, i32, i32) {
    %c0_i32 = arith.constant 0 : i32
    %c0_i32_0 = arith.constant 0 : i32
    %c0_i32_1 = arith.constant 0 : i32
    return %arg0, %c0_i32, %c0_i32_0 : i32, i32, i32
  }
  func.func @transform_1(%arg0: i32) -> (i32, i32) {
    %c0_i32 = arith.constant 0 : i32
    %c0_i32_0 = arith.constant 0 : i32
    %c0_i32_1 = arith.constant 0 : i32
    return %c0_i32, %c0_i32_0 : i32, i32
  }
  func.func @transform_2(%arg0: i32) -> (i32, i32) {
    %c0_i32 = arith.constant 0 : i32
    %c0_i32_0 = arith.constant 0 : i32
    %c0_i32_1 = arith.constant 0 : i32
    return %c0_i32, %c0_i32_0 : i32, i32
  }
  func.func @transform_3(%arg0: i32) -> (i32, i32) {
    %c0_i32 = arith.constant 0 : i32
    %c0_i32_0 = arith.constant 0 : i32
    %c0_i32_1 = arith.constant 0 : i32
    return %c0_i32, %c0_i32_0 : i32, i32
  }
  func.func @transform_4(%arg0: i32) -> (i32, i32) {
    %c0_i32 = arith.constant 0 : i32
    %c0_i32_0 = arith.constant 0 : i32
    %c0_i32_1 = arith.constant 0 : i32
    return %c0_i32, %c0_i32_0 : i32, i32
  }
  func.func @transform_5(%arg0: i32) -> (i32, i32) {
    %c0_i32 = arith.constant 0 : i32
    %c0_i32_0 = arith.constant 0 : i32
    %c0_i32_1 = arith.constant 0 : i32
    return %c0_i32, %c0_i32_0 : i32, i32
  }
  func.func @transform_6(%arg0: i32) -> (i32, i32) {
    %c0_i32 = arith.constant 0 : i32
    %c0_i32_0 = arith.constant 0 : i32
    %c0_i32_1 = arith.constant 0 : i32
    return %c0_i32, %c0_i32_0 : i32, i32
  }
  func.func @transform_7(%arg0: i32) -> (i32, i32) {
    %c0_i32 = arith.constant 0 : i32
    %c0_i32_0 = arith.constant 0 : i32
    %c0_i32_1 = arith.constant 0 : i32
    return %c0_i32, %c0_i32_0 : i32, i32
  }
  func.func @transform_8(%arg0: i32) -> (i32, i32, i32) {
    %c0_i32 = arith.constant 0 : i32
    %c0_i32_0 = arith.constant 0 : i32
    %c0_i32_1 = arith.constant 0 : i32
    return %arg0, %c0_i32, %c0_i32_0 : i32, i32, i32
  }
}

</mosaic_0001>

<bundles_post_ra>
// kernel: tpu_custom_call.1
= control target key start
LH: loop header
LB: loop body
LE: loop exit
PB: predicated region body
PF: predicated region fallthrough
CT: control target
= control target key end

     0   :  { %13 = vsyncpa [#allocation3], 0  ;;  %s2203_s0 = inlined_call_operand.vmem [shape: f32[2,8,256], index: 0, kind: input, shape index: {}]   ;;  %s2204_s1 = inlined_call_operand.vmem [shape: f32[9,256], index: 1, kind: input, shape index: {}]   ;;  %s2205_s2 = inlined_call_operand.vmem [shape: bf16[32,8], index: 2, kind: input, shape index: {}]   ;;  %s2206_s3 = inlined_call_operand.vmem [shape: f32[32,1], index: 3, kind: input, shape index: {}]   ;;  %s2207_s4 = inlined_call_operand.vmem [shape: f32[32,9], index: 4, kind: input, shape index: {}]   ;;  %s2208_s5 = inlined_call_operand.vmem [shape: f32[32,1], index: 5, kind: input, shape index: {}]   ;;  %s2209_s6 = inlined_call_operand.vmem [shape: bf16[8,32], index: 6, kind: input, shape index: {}]   ;;  %s2210_s7 = inlined_call_operand.vmem [shape: f32[8,1], index: 7, kind: input, shape index: {}]   ;;  %s2211_s8 = inlined_call_operand.hbm [shape: f32[2,8,256], index: 8, kind: output, shape index: {}]  }
   0x1   :  { %15 = vsyncpa [#allocation3 + $0x1], 0  ;;  %s1447_s27 = smov 0   ;;  %s1449_s28 = smov 0  }
   0x2   :  { %s1451_s29 = smov 0   ;;  %s1453_s30 = smov 0  }
   0x3 LB: > { %s1468_s9 = sadd.s32 4294967295, %s1383_s30   ;;  %s1193_s10 = sadd.s32 4294967294, %s1383_s30   ;;  %s1383_s30 = sphi %s1453_s30, %s2217_s30   ;;  %s1379_s29 = sphi %s1451_s29, %s2216_s29   ;;  %s1375_s28 = sphi %s1449_s28, %s2215_s28   ;;  %s1371_s27 = sphi %s1447_s27, %s2214_s27  }
   0x4   : > { %s1472_s11 = sadd.s32 1, %s1383_s30   ;;  %s201_s12 = sadd.s32 1, %s1379_s29 }
   0x5   : > { %s198_s13 = ssub.s32 %s1383_s30, %s1472_s11  ;;  %p211_p0 = scmp.ne.s32.totalorder %s1379_s29, %s1375_s28 }
   0x6   : > { %p199_p1 = scmp.eq.s32.totalorder %s198_s13, 0  ;;  %p212_p2 = scmp.eq.s32.totalorder %s1468_s9, 1 }
   0x7   : > { %p217_p3 = scmp.ne.s32.totalorder %s1375_s28, %s1371_s27  ;;  %p218_p4 = scmp.eq.s32.totalorder %s1193_s10, 1 }
   0x8   : > { %s1483_s14 = scalar_select %p199_p1, %s1379_s29, %s201_s12  }
   0x9   : > { %p1485_p5 = por %p212_p2, %p211_p0  ;;  %p1489_p6 = por %p218_p4, %p217_p3 }
   0xa   : > { %p1196_p7 = scmp.ge.s32.totalorder %s1383_s30, 1  ;;  %p265_p8 = scmp.lt.s32.totalorder %s1383_s30, 3 }
   0xc   : > { %p266_p9 = pnand %p1196_p7, %p265_p8 }
   0xd   : > { %p299_p10 = scmp.lt.s32.totalorder (!%p266_p9), %s1468_s9, 1  ;;  %s1390_s17 = smov (!%p266_p9), 17  }
   0xe   : > { %269 = sbr.rel (%p266_p9) target bundleno = 668 (0x29c), region = 52  ;;  %s1391_s18 = smov (!%p266_p9), 15  }
   0xf   : > { %s1393_s20 = smov (!%p266_p9), 1   ;;  %s1394_s21 = smov (!%p266_p9), 127  }
  0x10   : > { %s1396_s22 = smov (!%p266_p9), 113   ;;  %s1398_s23 = smov (!%p266_p9), 112  }
  0x13   : > { %v1498_v0 = vld [vmem:[%s2207_s4 + $0x10] sm:$0xff]  ;;  %v1385_v1 = vmov 4   ;;  %v1386_v2 = vmov 0   ;;  %s300_s19 = scalar_select %p299_p10, %s1468_s9, 1  ;;  %v1510_v4 = vld [vmem:[%s2207_s4] sm:$0xff]  ;;  %vm354_vm0 = vcmask 1043456  }
  0x14   : > { %1288 = vset.pattern.permute.xlu0 %v1385_v1  ;;  %1286 = vset.pattern.permute.xlu1 %v1386_v2  ;;  %v315_v3 = vld [vmem:[%s2206_s3 + $0x10] sm:$0xff]  ;;  %v313_v9 = vld [vmem:[%s2206_s3] sm:$0xff]  ;;  %v316_v13 = vld [vmem:[%s2206_s3 + $0x18] sm:$0xff]  ;;  %vm347_vm1 = vcmask 64512   ;;  %v1387_v18 = vmov 1   ;;  %v1388_v19 = vmov 2  }
  0x15   : > { %431 = vperm.xlu0 %1288, %v1498_v0   ;;  %1287 = vset.pattern.permute.xlu2 %v1385_v1  ;;  %s1226_s24 = sshll.u32 %s300_s19, 4  ;;  %v1227_v12 = vld [vmem:[%s2205_s2] sm:$0xff]  ;;  %v1533_v14 = vld [vmem:[%s2207_s4 + $0x8] sm:$0xff]  ;;  %v1544_v16 = vld [vmem:[%s2207_s4 + $0x18] sm:$0xff]  ;;  %v1389_v20 = vmov 3   ;;  %s1392_s19 = smov 16  }
  0x16   : > { %329 = vperm.xlu1 %1286, %v315_v3   ;;  %421 = vperm.xlu2 %1287, %v1510_v4   ;;  %s1516_s10 = scalar_lea.vmem %s2203_s0, %s1226_s24  ;;  %v314_v15 = vld [vmem:[%s2206_s3 + $0x8] sm:$0xff]  ;;  %v1395_v58 = vmov 5   ;;  %vm1083_vm10 = vcmask 261120  }
  0x17   : > { %v305_v5 = vld [vmem:[%s1516_s10] sm:$0xff]  ;;  %v306_v6 = vld [vmem:[%s1516_s10 + $0x8] sm:$0xff] }
  0x18   : > { %v311_v7 = vpack.c.bf16 %v305_v5, %v305_v5  ;;  %v312_v8 = vpack.c.bf16 %v306_v6, %v306_v6  ;;  %v1228_v17 = vld [vmem:[%s2205_s2 + $0x8] sm:$0xff] }
  0x1a   : > { %v356_v10 = vsel %vm354_vm0, %v311_v7, 0  ;;  %v359_v11 = vsel %vm354_vm0, %v312_v8, 0 }
  0x1b   : > { %368 = vmatpush.bf16.msra.mxu0 %v356_v10  ;;  %387 = vmatpush.bf16.msra.mxu1 %v359_v11 }
  0x1d   : > { %1289 = vset.pattern.permute.xlu0 %v1386_v2 }
  0x1e   : > { %319 = vperm.xlu0 %1289, %v313_v9   ;;  %426 = vperm.xlu2 %1287, %v1533_v14  }
  0x1f   : > { %334 = vperm.xlu1 %1286, %v316_v13   ;;  %1208 = vmatmul.msk.bf16.vlgmr.msra.gmra.mxu0 %vm347_vm1, %v1227_v12 }
  0x20   : > { %1210 = vmatmul.msk.bf16.vlgmr.msra.gmra.mxu1 %vm347_vm1, %v1227_v12 }
  0x26   : > { %324 = vperm.xlu0 %1289, %v314_v15   ;;  %1291 = vset.pattern.permute.xlu2 %v1386_v2 }
  0x27   : > { %1290 = vset.pattern.permute.xlu1 %v1385_v1  ;;  %475 = vperm.xlu2 %1291, %v1510_v4  }
  0x28   : > { %436 = vperm.xlu1 %1290, %v1544_v16  }
  0x2e   : > { %479 = vperm.xlu0 %1289, %v1533_v14  }
  0x2f   : > { %1209 = vmatmul.msk.bf16.gmra.mxu0 %vm347_vm1, %v1228_v17  ;;  %487 = vperm.xlu2 %1291, %v1544_v16  }
  0x30   : > { %1292 = vset.pattern.permute.xlu1 %v1386_v2  ;;  %1211 = vmatmul.msk.bf16.gmra.mxu1 %vm347_vm1, %v1228_v17 }
  0x31   : > { %483 = vperm.xlu1 %1292, %v1498_v0  }
  0x36   : > { %1293 = vset.pattern.permute.xlu0 %v1387_v18 }
  0x37   : > { %546 = vperm.xlu0 %1293, %v1510_v4   ;;  %1295 = vset.pattern.permute.xlu2 %v1387_v18 }
  0x38   : > { %554 = vperm.xlu2 %1295, %v1498_v0  }
  0x39   : > { %1294 = vset.pattern.permute.xlu1 %v1387_v18 }
  0x3a   : > { %550 = vperm.xlu1 %1294, %v1533_v14  }
  0x3f   : > { %1298 = vset.pattern.permute.xlu0 %v1388_v19 }
  0x40   : > { %626 = vperm.xlu0 %1298, %v1498_v0   ;;  %1297 = vset.pattern.permute.xlu2 %v1388_v19 }
  0x41   : > { %622 = vperm.xlu2 %1297, %v1533_v14  }
  0x42   : > { %558 = vperm.xlu1 %1294, %v1544_v16  }
  0x48   : > { %1300 = vset.pattern.permute.xlu0 %v1389_v20 }
  0x49   : > { %1299 = vset.pattern.permute.xlu2 %v1389_v20  ;;  %694 = vperm.xlu0 %1300, %v1533_v14  }
  0x4a   : > { %1296 = vset.pattern.permute.xlu1 %v1388_v19  ;;  %690 = vperm.xlu2 %1299, %v1510_v4   ;;  %v1397_v19 = vmov 6  }
  0x4b   : > { %618 = vperm.xlu1 %1296, %v1510_v4  }
  0x51   : > { %1302 = vset.pattern.permute.xlu0 %v1395_v58 }
  0x52   : > { %702 = vperm.xlu2 %1299, %v1544_v16  }
  0x53   : > { %630 = vperm.xlu1 %1296, %v1544_v16  }
  0x5a   : > { %1305 = vset.pattern.permute.xlu2 %v1397_v19 }
  0x5b   : > { %1301 = vset.pattern.permute.xlu1 %v1389_v20 }
  0x5c   : > { %698 = vperm.xlu1 %1301, %v1498_v0  }
  0x64   : > { %1303 = vset.pattern.permute.xlu1 %v1395_v58 }
  0x70   : > { %v1590_v38 = vpop.permute.xlu2 %421 }
  0x78   : > { %v1600_v46 = vpop.permute.xlu2 %426 }
  0x81   : > { %v1610_v50 = vpop.permute.xlu2 %475 }
  0x87   : > { %v1570_v21 = vpop.permute.xlu0 %431 }
  0x88   : > { %v330_v40 = vpop.permute.xlu1 %329 }
  0x89   : > { %v1622_v53 = vpop.permute.xlu2 %487 }
  0x90   : > { %v320_v22 = vpop.permute.xlu0 %319 }
  0x91   : > { %v335_v52 = vpop.permute.xlu1 %334 }
  0x92   : > { %v1636_v57 = vpop.permute.xlu2 %554 }
  0x98   : > { %v325_v31 = vpop.permute.xlu0 %324 }
  0x9a   : > { %v1630_v56 = vpop.permute.xlu1 %436 }
  0x9b   : > { %v1650_v3 = vpop.permute.xlu2 %622 }
  0x9c   : > { %v370_v23 = vpop.f32.mrf.mxu0 }
  0x9d   : > { %v371_v24 = vadd.f32 %v370_v23, %v320_v22  ;;  %v389_v25 = vpop.f32.mrf.mxu1  ;;  %v463_v23 = vlaneseq }
  0x9e   : > { %v390_v26 = vadd.f32 %v389_v25, %v320_v22 }
  0x9f   : > { %v399_v27 = vmax.f32 %v371_v24, 0.0  ;;  %v1711_v25 = vand.u32 127, %v463_v23 }
  0xa0   : > { %v400_v28 = vmax.f32 %v390_v26, 0.0  ;;  %v1670_v8 = vpop.permute.xlu0 %479  ;;  %v498_v26 = vld [vmem:[%s2204_s1] ss:$8 sm:$0x3] }
  0xa1   : > { %v1572_v29 = vmin.f32 %v399_v27, 6.0  ;;  %vm608_vm2 = vcmp.lt.s32.totalorder %v1711_v25, 15  ;;  %vm465_vm3 = vcmp.lt.s32.totalorder %v1711_v25, 17  ;;  %vm536_vm4 = vcmp.lt.s32.totalorder %v1711_v25, 16 }
  0xa2   : > { %v1574_v30 = vmin.f32 %v400_v28, 6.0  ;;  %vm680_vm5 = vcmp.lt.s32.totalorder %v1711_v25, 1  ;;  %vm752_vm6 = vcmp.lt.s32.totalorder %v1711_v25, 127  ;;  %vm824_vm7 = vcmp.lt.s32.totalorder %v1711_v25, 113 }
  0xa3   : > { %447 = vrot.lane.b32.xlu2 %v1572_v29, %s1390_s17  ;;  %v1644_v63 = vpop.permute.xlu1 %483  ;;  %vm896_vm8 = vcmp.lt.s32.totalorder %v1711_v25, 112  ;;  %vm968_vm9 = vcmp.lt.s32.totalorder %v1711_v25, 111 }
  0xa4   : > { %600 = vrot.lane.b32.xlu0 %v1574_v30, %s1391_s18  ;;  %455 = vrot.lane.b32.xlu1 %v1574_v30, %s1390_s17  ;;  %v372_v34 = vpop.f32.mrf.mxu0  ;;  %v1662_v7 = vpop.permute.xlu2 %690 }
  0xa5   : > { %v391_v32 = vpop.f32.mrf.mxu1  ;;  %v373_v36 = vadd.f32 %v372_v34, %v325_v31 }
  0xa6   : > { %v392_v33 = vadd.f32 %v391_v32, %v325_v31  ;;  %v1723_v31 = vperm.slane %v498_v26, 0  ;;  %v1725_v32 = vperm.slane %v498_v26, 1 }
  0xa7   : > { %v401_v39 = vmax.f32 %v373_v36, 0.0 }
  0xa8   : > { %v402_v35 = vmax.f32 %v392_v33, 0.0 }
  0xa9   : > { %v1592_v42 = vmin.f32 %v401_v39, 6.0  ;;  %v1682_v11 = vpop.permute.xlu0 %546 }
  0xaa   : > { %v1582_v37 = vmin.f32 %v402_v35, 6.0 }
  0xab   : > { %528 = vrot.lane.b32.xlu2 %v1574_v30, %s1392_s19 }
  0xac   : > { %530 = vrot.lane.b32.xlu0 %v1582_v37, %s1392_s19  ;;  %520 = vrot.lane.b32.xlu1 %v1572_v29, %s1392_s19  ;;  %v375_v45 = vpop.f32.mrf.mxu0  ;;  %v1660_v6 = vpop.permute.xlu1 %550 }
  0xad   : > { %v394_v41 = vpop.f32.mrf.mxu1  ;;  %v376_v47 = vadd.f32 %v375_v45, %v330_v40  ;;  %v1676_v10 = vpop.permute.xlu2 %702  ;;  %v439_v45 = vmul.f32 %v1590_v38, %v1572_v29 }
  0xae   : > { %v395_v43 = vadd.f32 %v394_v41, %v330_v40 }
  0xaf   : > { %v403_v49 = vmax.f32 %v376_v47, 0.0  ;;  %v440_v47 = vmul.f32 %v1590_v38, %v1574_v30 }
  0xb0   : > { %v404_v44 = vmax.f32 %v395_v43, 0.0 }
  0xb1   : > { %v1612_v51 = vmin.f32 %v403_v49, 6.0 }
  0xb2   : > { %v1602_v48 = vmin.f32 %v404_v44, 6.0  ;;  %v1689_v15 = vpop.permute.xlu0 %626 }
  0xb3   : > { %592 = vrot.lane.b32.xlu2 %v1572_v29, %s1391_s18 }
  0xb4   : > { %594 = vrot.lane.b32.xlu0 %v1592_v42, %s1391_s18  ;;  %672 = vrot.lane.b32.xlu1 %v1574_v30, %s1393_s20  ;;  %v377_v54 = vpop.f32.mrf.mxu0  ;;  %v1672_v9 = vpop.permute.xlu1 %558 }
  0xb5   : > { %v378_v55 = vadd.f32 %v377_v54, %v335_v52  ;;  %v396_v60 = vpop.f32.mrf.mxu1  ;;  %v1212_v54 = vld [vmem:[%s2204_s1 + $0x1] ss:$8 sm:$0x3] }
  0xb6   : > { %v397_v62 = vadd.f32 %v396_v60, %v335_v52 }
  0xb7   : > { %v405_v59 = vmax.f32 %v378_v55, 0.0 }
  0xb8   : > { %v406_v1 = vmax.f32 %v397_v62, 0.0  ;;  %v1757_v62 = vperm.slane %v1212_v54, 0 }
  0xb9   : > { %v1640_v61 = vmin.f32 %v405_v59, 6.0 }
  0xba   : > { %v1652_v5 = vmin.f32 %v406_v1, 6.0  ;;  %v1759_v1 = vperm.slane %v1212_v54, 1 }
  0xbb   : > { %664 = vrot.lane.b32.xlu2 %v1572_v29, %s1393_s20  ;;  %v1709_v22 = vpop.permute.xlu0 %694 }
  0xbc   : > { %459 = vrot.lane.b32.xlu0 %v1602_v48, %s1390_s17  ;;  %736 = vrot.lane.b32.xlu1 %v1572_v29, %s1394_s21 }
  0xbd   : > { %v619_v12 = vpop.permute.xlu1 %618 }
  0xc3   : > { %744 = vrot.lane.b32.xlu2 %v1574_v30, %s1394_s21 }
  0xc4   : > { %524 = vrot.lane.b32.xlu0 %v1612_v51, %s1392_s19  ;;  %449 = vrot.lane.b32.xlu1 %v1592_v42, %s1390_s17 }
  0xc5   : > { %v1693_v17 = vpop.permute.xlu1 %630 }
  0xcb   : > { %457 = vrot.lane.b32.xlu2 %v1582_v37, %s1390_s17 }
  0xcc   : > { %676 = vrot.lane.b32.xlu0 %v1602_v48, %s1393_s20  ;;  %602 = vrot.lane.b32.xlu1 %v1582_v37, %s1391_s18 }
  0xce   : > { %v1707_v20 = vpop.permute.xlu1 %698 }
  0xd3   : > { %522 = vrot.lane.b32.xlu2 %v1592_v42, %s1392_s19 }
  0xd4   : > { %740 = vrot.lane.b32.xlu0 %v1612_v51, %s1394_s21  ;;  %666 = vrot.lane.b32.xlu1 %v1592_v42, %s1393_s20 }
  0xdb   : > { %674 = vrot.lane.b32.xlu2 %v1582_v37, %s1393_s20 }
  0xdc   : > { %453 = vrot.lane.b32.xlu0 %v1640_v61, %s1390_s17  ;;  %532 = vrot.lane.b32.xlu1 %v1602_v48, %s1392_s19 }
  0xe3   : > { %738 = vrot.lane.b32.xlu2 %v1592_v42, %s1394_s21 }
  0xe4   : > { %606 = vrot.lane.b32.xlu0 %v1652_v5, %s1391_s18  ;;  %596 = vrot.lane.b32.xlu1 %v1612_v51, %s1391_s18 }
  0xeb   : > { %451 = vrot.lane.b32.xlu2 %v1612_v51, %s1390_s17 }
  0xec   : > { %670 = vrot.lane.b32.xlu0 %v1640_v61, %s1393_s20  ;;  %461 = vrot.lane.b32.xlu1 %v1652_v5, %s1390_s17  ;;  %s296_s17 = sand.u32 1, %s1375_s28  }
  0xf3   : > { %604 = vrot.lane.b32.xlu2 %v1602_v48, %s1391_s18 }
  0xf4   : > { %746 = vrot.lane.b32.xlu0 %v1582_v37, %s1394_s21  ;;  %526 = vrot.lane.b32.xlu1 %v1640_v61, %s1392_s19 }
  0xfb   : > { %668 = vrot.lane.b32.xlu2 %v1612_v51, %s1393_s20 }
  0xfc   : > { %770 = vperm.xlu0 %1302, %v1498_v0   ;;  %678 = vrot.lane.b32.xlu1 %v1652_v5, %s1393_s20  ;;  %s1399_s20 = smov 111  }
  0xfd   : > { %v448_v13 = vpop.permute.xlu2 %447 }
 0x103   : > { %534 = vrot.lane.b32.xlu2 %v1652_v5, %s1392_s19  ;;  %s1229_s19 = sshll.u32 %s1468_s9, 4  ;;  %s1118_s9 = scalar_lea.sflag [#allocation3], %s296_s17 }
 0x104   : > { %822 = vrot.lane.b32.xlu0 %v1652_v5, %s1396_s22  ;;  %742 = vrot.lane.b32.xlu1 %v1640_v61, %s1394_s21 }
 0x105   : > { %v529_v18 = vpop.permute.xlu2 %528  ;;  %1310 = vset.pattern.permute.xlu0 %v1397_v19 }
 0x10b   : > { %598 = vrot.lane.b32.xlu2 %v1640_v61, %s1391_s18  ;;  %s1197_s18 = sshll.u32 %s296_s17, 4 }
 0x10c   : > { %884 = vrot.lane.b32.xlu0 %v1612_v51, %s1398_s23  ;;  %748 = vrot.lane.b32.xlu1 %v1602_v48, %s1394_s21 }
 0x10d   : > { %v593_v24 = vpop.permute.xlu2 %592 }
 0x113   : > { %750 = vrot.lane.b32.xlu2 %v1652_v5, %s1394_s21 }
 0x114   : > { %894 = vrot.lane.b32.xlu0 %v1652_v5, %s1398_s23  ;;  %774 = vperm.xlu1 %1303, %v1544_v16  }
 0x115   : > { %v665_v27 = vpop.permute.xlu2 %664 }
 0x116   : > { %v601_v28 = vpop.permute.xlu0 %600  ;;  %v456_v33 = vpop.permute.xlu1 %455 }
 0x117   : > { %v609_v34 = vsel %vm608_vm2, %v593_v24, %v601_v28  ;;  %v613_v35 = vsel %vm608_vm2, %v601_v28, %v593_v24  ;;  %v466_v36 = vsel %vm465_vm3, %v448_v13, %v456_v33  ;;  %v470_v39 = vsel %vm465_vm3, %v456_v33, %v448_v13 }
 0x118   : > { %v633_v40 = vmul.f32 %v619_v12, %v613_v35  ;;  %v634_v41 = vmul.f32 %v619_v12, %v609_v34  ;;  %v490_v43 = vmul.f32 %v1610_v50, %v470_v39  ;;  %v491_v44 = vmul.f32 %v1610_v50, %v466_v36  ;;  %v1213_v50 = vld [vmem:[%s2204_s1 + $0x2] ss:$8 sm:$0x3]  ;;  %v1214_v39 = vld [vmem:[%s2204_s1 + $0x3] ss:$8 sm:$0x3] }
 0x119   : > { %v1761_v13 = vperm.slane %v1213_v50, 0  ;;  %v1767_v26 = vperm.slane %v1213_v50, 1 }
 0x11a   : > { %v504_v49 = vmul.f32 %v1723_v31, %v490_v43  ;;  %v505_v52 = vmul.f32 %v1725_v32, %v491_v44 }
 0x11b   : > { %812 = vrot.lane.b32.xlu2 %v1612_v51, %s1396_s22  ;;  %v648_v36 = vmul.f32 %v1761_v13, %v633_v40 }
 0x11c   : > { %v512_v55 = vadd.f32 %v504_v49, %v439_v45  ;;  %v513_v59 = vadd.f32 %v505_v52, %v440_v47  ;;  %818 = vrot.lane.b32.xlu0 %v1582_v37, %s1396_s22  ;;  %814 = vrot.lane.b32.xlu1 %v1640_v61, %s1396_s22  ;;  %v1784_v45 = vperm.slane %v1214_v39, 0  ;;  %v1786_v47 = vperm.slane %v1214_v39, 1 }
 0x11d   : > { %v745_v38 = vpop.permute.xlu2 %744  ;;  %1304 = vset.pattern.permute.xlu1 %v1397_v19 }
 0x11e   : > { %v531_v60 = vpop.permute.xlu0 %530  ;;  %v521_v12 = vpop.permute.xlu1 %520 }
 0x11f   : > { %v537_v23 = vsel %vm536_vm4, %v521_v12, %v529_v18  ;;  %v541_v24 = vsel %vm536_vm4, %v529_v18, %v521_v12  ;;  %v649_v18 = vmul.f32 %v1767_v26, %v634_v41 }
 0x120   : > { %v561_v28 = vmul.f32 %v1682_v11, %v541_v24  ;;  %v562_v33 = vmul.f32 %v1682_v11, %v537_v23 }
 0x122   : > { %v576_v34 = vmul.f32 %v1757_v62, %v561_v28  ;;  %v577_v35 = vmul.f32 %v1759_v1, %v562_v33 }
 0x123   : > { %820 = vrot.lane.b32.xlu2 %v1602_v48, %s1396_s22 }
 0x124   : > { %v584_v43 = vadd.f32 %v576_v34, %v512_v55  ;;  %v585_v44 = vadd.f32 %v577_v35, %v513_v59  ;;  %964 = vrot.lane.b32.xlu0 %v1602_v48, %s1399_s20  ;;  %842 = vperm.xlu1 %1304, %v1498_v0  }
 0x125   : > { %v458_v11 = vpop.permute.xlu2 %457 }
 0x126   : > { %v595_v40 = vpop.permute.xlu0 %594  ;;  %v673_v49 = vpop.permute.xlu1 %672  ;;  %v656_v52 = vadd.f32 %v648_v36, %v584_v43  ;;  %v657_v54 = vadd.f32 %v649_v18, %v585_v44  ;;  %v1400_v18 = vmov 7  }
 0x127   : > { %v681_v41 = vsel %vm680_vm5, %v665_v27, %v673_v49  ;;  %v685_v50 = vsel %vm680_vm5, %v673_v49, %v665_v27 }
 0x128   : > { %v705_v55 = vmul.f32 %v1662_v7, %v685_v50  ;;  %v706_v59 = vmul.f32 %v1662_v7, %v681_v41 }
 0x12a   : > { %v720_v12 = vmul.f32 %v1784_v45, %v705_v55  ;;  %v721_v23 = vmul.f32 %v1786_v47, %v706_v59  ;;  %v442_v55 = vmul.f32 %v1600_v46, %v1582_v37 }
 0x12b   : > { %846 = vperm.xlu2 %1305, %v1544_v16  }
 0x12c   : > { %v1797_v24 = vadd.f32 %v720_v12, %v656_v52  ;;  %v1799_v28 = vadd.f32 %v721_v23, %v657_v54  ;;  %838 = vperm.xlu0 %1310, %v1533_v14   ;;  %886 = vrot.lane.b32.xlu1 %v1640_v61, %s1398_s23 }
 0x12d   : > { %v523_v27 = vpop.permute.xlu2 %522  ;;  %1306 = vset.pattern.permute.xlu1 %v1395_v58 }
 0x12e   : > { %v460_v7 = vpop.permute.xlu0 %459  ;;  %v737_v33 = vpop.permute.xlu1 %736  ;;  %v538_v34 = vsel %vm536_vm4, %v523_v27, %v531_v60  ;;  %v542_v35 = vsel %vm536_vm4, %v531_v60, %v523_v27 }
 0x12f   : > { %v1812_v36 = vsel %vm752_vm6, %v737_v33, %v745_v38  ;;  %v1816_v39 = vsel %vm752_vm6, %v745_v38, %v737_v33  ;;  %v563_v52 = vmul.f32 %v1660_v6, %v542_v35  ;;  %v564_v54 = vmul.f32 %v1660_v6, %v538_v34 }
 0x131   : > { %v579_v6 = vmul.f32 %v1759_v1, %v564_v54 }
 0x133   : > { %892 = vrot.lane.b32.xlu2 %v1602_v48, %s1398_s23 }
 0x134   : > { %1311 = vset.pattern.permute.xlu0 %v1400_v18  ;;  %762 = vperm.xlu1 %1306, %v1510_v4  }
 0x135   : > { %914 = vperm.xlu0 %1311, %v1498_v0   ;;  %v675_v43 = vpop.permute.xlu2 %674  ;;  %1307 = vset.pattern.permute.xlu2 %v1395_v58  ;;  %v441_v58 = vmul.f32 %v1600_v46, %v1592_v42 }
 0x136   : > { %v1824_v60 = vpop.permute.xlu0 %524  ;;  %v450_v44 = vpop.permute.xlu1 %449 }
 0x137   : > { %v467_v38 = vsel %vm465_vm3, %v450_v44, %v458_v11  ;;  %v471_v49 = vsel %vm465_vm3, %v458_v11, %v450_v44  ;;  %v578_v11 = vmul.f32 %v1757_v62, %v563_v52 }
 0x138   : > { %v492_v41 = vmul.f32 %v1670_v8, %v471_v49  ;;  %v493_v50 = vmul.f32 %v1670_v8, %v467_v38 }
 0x13a   : > { %v506_v59 = vmul.f32 %v1723_v31, %v492_v41  ;;  %v507_v12 = vmul.f32 %v1725_v32, %v493_v50 }
 0x13b   : > { %766 = vperm.xlu2 %1307, %v1533_v14  }
 0x13c   : > { %v514_v23 = vadd.f32 %v506_v59, %v441_v58  ;;  %v515_v27 = vadd.f32 %v507_v12, %v442_v55  ;;  %1308 = vset.pattern.permute.xlu1 %v1400_v18 }
 0x13d   : > { %888 = vrot.lane.b32.xlu0 %v1574_v30, %s1398_s23  ;;  %918 = vperm.xlu1 %1308, %v1544_v16   ;;  %v1847_v46 = vpop.permute.xlu2 %738 }
 0x13e   : > { %v677_v8 = vpop.permute.xlu0 %676  ;;  %v603_v33 = vpop.permute.xlu1 %602  ;;  %v586_v34 = vadd.f32 %v578_v11, %v514_v23  ;;  %v587_v35 = vadd.f32 %v579_v6, %v515_v27  ;;  %v1401_v11 = vmov 8  }
 0x13f   : > { %v610_v44 = vsel %vm608_vm2, %v595_v40, %v603_v33  ;;  %v614_v38 = vsel %vm608_vm2, %v603_v33, %v595_v40 }
 0x140   : > { %v635_v49 = vmul.f32 %v1650_v3, %v614_v38  ;;  %v636_v52 = vmul.f32 %v1650_v3, %v610_v44 }
 0x142   : > { %v650_v54 = vmul.f32 %v1761_v13, %v635_v49  ;;  %v651_v41 = vmul.f32 %v1767_v26, %v636_v52 }
 0x143   : > { %808 = vrot.lane.b32.xlu2 %v1572_v29, %s1396_s22 }
 0x144   : > { %v658_v50 = vadd.f32 %v650_v54, %v586_v34  ;;  %v659_v58 = vadd.f32 %v651_v41, %v587_v35  ;;  %1309 = vset.pattern.permute.xlu2 %v1397_v19  ;;  %v444_v35 = vmul.f32 %v1570_v21, %v1602_v48 }
 0x145   : > { %810 = vrot.lane.b32.xlu1 %v1592_v42, %s1396_s22  ;;  %v452_v55 = vpop.permute.xlu2 %451  ;;  %910 = vperm.xlu0 %1311, %v1533_v14  }
 0x146   : > { %v1863_v40 = vpop.permute.xlu0 %740  ;;  %v667_v3 = vpop.permute.xlu1 %666  ;;  %v468_v59 = vsel %vm465_vm3, %v452_v55, %v460_v7  ;;  %v472_v12 = vsel %vm465_vm3, %v460_v7, %v452_v55  ;;  %1312 = vset.pattern.permute.xlu1 %v1401_v11  ;;  %v443_v7 = vmul.f32 %v1570_v21, %v1612_v51 }
 0x147   : > { %v682_v19 = vsel %vm680_vm5, %v667_v3, %v675_v43  ;;  %v686_v6 = vsel %vm680_vm5, %v675_v43, %v667_v3  ;;  %v494_v23 = vmul.f32 %v1644_v63, %v472_v12  ;;  %v495_v27 = vmul.f32 %v1644_v63, %v468_v59 }
 0x148   : > { %v707_v33 = vmul.f32 %v1709_v22, %v686_v6  ;;  %v708_v34 = vmul.f32 %v1709_v22, %v682_v19 }
 0x149   : > { %v508_v44 = vmul.f32 %v1723_v31, %v494_v23  ;;  %v509_v38 = vmul.f32 %v1725_v32, %v495_v27 }
 0x14a   : > { %v722_v43 = vmul.f32 %v1784_v45, %v707_v33  ;;  %v723_v49 = vmul.f32 %v1786_v47, %v708_v34 }
 0x14b   : > { %v516_v52 = vadd.f32 %v508_v44, %v443_v7  ;;  %v517_v63 = vadd.f32 %v509_v38, %v444_v35  ;;  %816 = vrot.lane.b32.xlu2 %v1574_v30, %s1396_s22  ;;  %s1129_s22 = scalar_lea.hbm %s2211_s8, %s1229_s19  ;;  %s1341_s19 = scalar_lea.hbm %s2211_s8, 32 }
 0x14c   : > { %v1888_v22 = vadd.f32 %v722_v43, %v658_v50  ;;  %v1890_v54 = vadd.f32 %v723_v49, %v659_v58  ;;  %s1133_s25 = sshll.u32 %s1129_s22, 4  ;;  %s1134_s25 = int_to_ptr.hbm [resolvable:$true] %s1133_s25 }
 0x14d   : > { %956 = vrot.lane.b32.xlu1 %v1612_v51, %s1399_s20  ;;  %v605_v21 = vpop.permute.xlu2 %604  ;;  %1315 = vset.pattern.permute.xlu0 %v1401_v11  ;;  %s1335_s26 = sshra.s32 %s1134_s25, 4  ;;  %s1336_s26 = int_to_ptr.hbm [resolvable:$true] %s1335_s26 }
 0x14e   : > { %v454_v48 = vpop.permute.xlu0 %453  ;;  %v533_v41 = vpop.permute.xlu1 %532  ;;  %978 = vperm.xlu0 %1315, %v1510_v4   ;;  %s1337_s12 = scalar_lea.hbm %s1336_s26, 16  ;;  %p1342_p0 = scmp.lt.s32.totalorder %s1336_s26, %s2211_s8 }
 0x14f   : > { %v539_v55 = vsel %vm536_vm4, %v1824_v60, %v533_v41  ;;  %v543_v50 = vsel %vm536_vm4, %v533_v41, %v1824_v60  ;;  %p1338_p11 = scmp.ne.s32.totalorder %s1336_s26, %s1337_s12  ;;  %p1343_p1 = scmp.lt.s32.totalorder %s1341_s19, %s1337_s12 }
 0x150   : > { %v565_v58 = vmul.f32 %v1636_v57, %v543_v50  ;;  %v566_v3 = vmul.f32 %v1636_v57, %v539_v55 }
 0x151   : > { %p1339_p12 = pnand %p1338_p11, %p1485_p5  ;;  %p1344_p2 = por %p1343_p1, %p1342_p0 }
 0x152   : > { %v580_v51 = vmul.f32 %v1757_v62, %v565_v58  ;;  %v581_v59 = vmul.f32 %v1759_v1, %v566_v3 }
 0x153   : > { %958 = vrot.lane.b32.xlu2 %v1640_v61, %s1399_s20  ;;  %p1340_p13 = pneg %p1339_p12 }
 0x154   : > { %v588_v12 = vadd.f32 %v580_v51, %v516_v52  ;;  %v589_v19 = vadd.f32 %v581_v59, %v517_v63 }
 0x155   : > { %966 = vrot.lane.b32.xlu1 %v1652_v5, %s1399_s20  ;;  %v669_v6 = vpop.permute.xlu2 %668  ;;  %p1345_p3 = pnand %p1344_p2, %p1340_p13 }
 0x156   : > { %v607_v23 = vpop.permute.xlu0 %606  ;;  %v597_v27 = vpop.permute.xlu1 %596  ;;  %v683_v60 = vsel %vm680_vm5, %v669_v6, %v677_v8  ;;  %v687_v57 = vsel %vm680_vm5, %v677_v8, %v669_v6  ;;  %1318 = vset.pattern.permute.xlu0 %v1386_v2 }
 0x157   : > { %v611_v33 = vsel %vm608_vm2, %v597_v27, %v605_v21  ;;  %v615_v34 = vsel %vm608_vm2, %v605_v21, %v597_v27  ;;  %v709_v44 = vmul.f32 %v1707_v20, %v687_v57  ;;  %v710_v38 = vmul.f32 %v1707_v20, %v683_v60 }
 0x158   : > { %v637_v7 = vmul.f32 %v1689_v15, %v615_v34  ;;  %v638_v35 = vmul.f32 %v1689_v15, %v611_v33 }
 0x159   : > { %v724_v63 = vmul.f32 %v1784_v45, %v709_v44  ;;  %v725_v21 = vmul.f32 %v1786_v47, %v710_v38 }
 0x15a   : > { %v652_v43 = vmul.f32 %v1761_v13, %v637_v7  ;;  %v653_v8 = vmul.f32 %v1767_v26, %v638_v35 }
 0x15b   : > { %834 = vperm.xlu2 %1309, %v1510_v4  }
 0x15c   : > { %v660_v49 = vadd.f32 %v652_v43, %v588_v12  ;;  %v661_v52 = vadd.f32 %v653_v8, %v589_v19  ;;  %v446_v12 = vmul.f32 %v1630_v56, %v1652_v5 }
 0x15d   : > { %986 = vperm.xlu1 %1312, %v1498_v0   ;;  %v535_v41 = vpop.permute.xlu2 %534  ;;  %v445_v0 = vmul.f32 %v1630_v56, %v1640_v61 }
 0x15e   : > { %v1929_v15 = vadd.f32 %v724_v63, %v660_v49  ;;  %v1931_v55 = vadd.f32 %v725_v21, %v661_v52  ;;  %v671_v20 = vpop.permute.xlu0 %670  ;;  %v462_v50 = vpop.permute.xlu1 %461 }
 0x15f   : > { %v469_v58 = vsel %vm465_vm3, %v454_v48, %v462_v50  ;;  %v473_v3 = vsel %vm465_vm3, %v462_v50, %v454_v48 }
 0x160   : > { %v496_v51 = vmul.f32 %v1622_v53, %v473_v3  ;;  %v497_v59 = vmul.f32 %v1622_v53, %v469_v58 }
 0x162   : > { %v510_v19 = vmul.f32 %v1723_v31, %v496_v51  ;;  %v511_v6 = vmul.f32 %v1725_v32, %v497_v59 }
 0x163   : > { %1313 = vset.pattern.permute.xlu2 %v1401_v11 }
 0x164   : > { %v518_v27 = vadd.f32 %v510_v19, %v445_v0  ;;  %v519_v60 = vadd.f32 %v511_v6, %v446_v12  ;;  %990 = vperm.xlu2 %1313, %v1544_v16  }
 0x165   : > { %880 = vrot.lane.b32.xlu1 %v1572_v29, %s1398_s23  ;;  %v599_v53 = vpop.permute.xlu2 %598 }
 0x166   : > { %v747_v48 = vpop.permute.xlu0 %746  ;;  %v527_v57 = vpop.permute.xlu1 %526  ;;  %v612_v61 = vsel %vm608_vm2, %v599_v53, %v607_v23  ;;  %v616_v56 = vsel %vm608_vm2, %v607_v23, %v599_v53 }
 0x167   : > { %v1956_v5 = vsel %vm752_vm6, %v1847_v46, %v747_v48  ;;  %v1961_v16 = vsel %vm752_vm6, %v747_v48, %v1847_v46  ;;  %v540_v31 = vsel %vm536_vm4, %v527_v57, %v535_v41  ;;  %v544_v32 = vsel %vm536_vm4, %v535_v41, %v527_v57  ;;  %v1025_v46 = vld [vmem:[%s2208_s5 + $0x8] sm:$0xff] }
 0x168   : > { %v567_v11 = vmul.f32 %v1672_v9, %v544_v32  ;;  %v568_v23 = vmul.f32 %v1672_v9, %v540_v31  ;;  %v639_v33 = vmul.f32 %v1693_v17, %v616_v56  ;;  %v640_v34 = vmul.f32 %v1693_v17, %v612_v61  ;;  %1035 = vperm.xlu0 %1318, %v1025_v46  }
 0x16a   : > { %v582_v7 = vmul.f32 %v1757_v62, %v567_v11  ;;  %v583_v35 = vmul.f32 %v1759_v1, %v568_v23  ;;  %v654_v43 = vmul.f32 %v1761_v13, %v639_v33  ;;  %v655_v8 = vmul.f32 %v1767_v26, %v640_v34 }
 0x16c   : > { %v590_v44 = vadd.f32 %v582_v7, %v518_v27  ;;  %v591_v38 = vadd.f32 %v583_v35, %v519_v60  ;;  %882 = vrot.lane.b32.xlu2 %v1592_v42, %s1398_s23 }
 0x16d   : > { %890 = vrot.lane.b32.xlu1 %v1582_v37, %s1398_s23  ;;  %v751_v9 = vpop.permute.xlu2 %750  ;;  %1314 = vset.pattern.permute.xlu2 %v1400_v18  ;;  %s298_s23 = scalar_lea.vmem [#allocation2], %s1197_s18 }
 0x16e   : > { %v662_v17 = vadd.f32 %v654_v43, %v590_v44  ;;  %v663_v62 = vadd.f32 %v655_v8, %v591_v38  ;;  %v771_v1 = vpop.permute.xlu0 %770  ;;  %v679_v49 = vpop.permute.xlu1 %678  ;;  %s1131_s24 = sshll.u32 %s298_s23, 4  ;;  %s1132_s24 = int_to_ptr.vmem [resolvable:$true] %s1131_s24 }
 0x16f   : > { %v684_v52 = vsel %vm680_vm5, %v671_v20, %v679_v49  ;;  %v688_v13 = vsel %vm680_vm5, %v679_v49, %v671_v20 }
 0x170   : > { %v711_v26 = vmul.f32 %v1676_v10, %v688_v13  ;;  %v712_v63 = vmul.f32 %v1676_v10, %v684_v52 }
 0x172   : > { %v726_v21 = vmul.f32 %v1784_v45, %v711_v26  ;;  %v727_v41 = vmul.f32 %v1786_v47, %v712_v63  ;;  %v1215_v45 = vld [vmem:[%s2204_s1 + $0x5] ss:$8 sm:$0x3] }
 0x173   : > { %v2009_v47 = vperm.slane %v1215_v45, 0  ;;  %v2011_v59 = vperm.slane %v1215_v45, 1 }
 0x174   : > { %v734_v50 = vadd.f32 %v726_v21, %v662_v17  ;;  %v735_v18 = vadd.f32 %v727_v41, %v663_v62  ;;  %906 = vperm.xlu2 %1314, %v1510_v4  }
 0x175   : > { %952 = vrot.lane.b32.xlu1 %v1572_v29, %s1399_s20  ;;  %v813_v58 = vpop.permute.xlu2 %812 }
 0x176   : > { %v823_v3 = vpop.permute.xlu0 %822  ;;  %v743_v51 = vpop.permute.xlu1 %742 }
 0x177   : > { %v756_v20 = vsel %vm752_vm6, %v743_v51, %v751_v9  ;;  %v760_v10 = vsel %vm752_vm6, %v751_v9, %v743_v51 }
 0x17c   : > { %954 = vrot.lane.b32.xlu2 %v1592_v42, %s1399_s20 }
 0x17d   : > { %960 = vrot.lane.b32.xlu1 %v1574_v30, %s1399_s20  ;;  %v821_v4 = vpop.permute.xlu2 %820  ;;  %1316 = vset.pattern.permute.xlu2 %v1386_v2 }
 0x17e   : > { %v2007_v29 = vpop.permute.xlu0 %884  ;;  %v749_v0 = vpop.permute.xlu1 %748  ;;  %v827_v12 = vsel %vm824_vm7, %v813_v58, %v821_v4  ;;  %v831_v19 = vsel %vm824_vm7, %v821_v4, %v813_v58 }
 0x17f   : > { %v755_v30 = vsel %vm752_vm6, %v1863_v40, %v749_v0  ;;  %v759_v42 = vsel %vm752_vm6, %v749_v0, %v1863_v40 }
 0x180   : > { %v781_v6 = vmul.f32 %v771_v1, %v755_v30  ;;  %v782_v27 = vmul.f32 %v771_v1, %v759_v42  ;;  %v1077_v1 = vld [vmem:[%s2210_s7] sm:$0xff] }
 0x182   : > { %v796_v60 = vmul.f32 %v2009_v47, %v781_v6  ;;  %v797_v53 = vmul.f32 %v2011_v59, %v782_v27 }
 0x184   : > { %v804_v48 = vadd.f32 %v796_v60, %v1929_v15  ;;  %v805_v57 = vadd.f32 %v797_v53, %v1931_v55  ;;  %962 = vrot.lane.b32.xlu2 %v1582_v37, %s1399_s20  ;;  %v1026_v15 = vld [vmem:[%s2208_s5 + $0x10] sm:$0xff]  ;;  %v1216_v37 = vld [vmem:[%s2204_s1 + $0x6] ss:$8 sm:$0x3] }
 0x185   : > { %982 = vperm.xlu1 %1312, %v1533_v14   ;;  %v847_v61 = vpop.permute.xlu2 %846  ;;  %v1027_v14 = vld [vmem:[%s2208_s5 + $0x18] sm:$0xff]  ;;  %v2046_v35 = vperm.slane %v1216_v37, 0  ;;  %v2048_v46 = vperm.slane %v1216_v37, 1 }
 0x186   : > { %v2030_v56 = vpop.permute.xlu0 %894  ;;  %v775_v31 = vpop.permute.xlu1 %774 }
 0x187   : > { %v783_v40 = vmul.f32 %v775_v31, %v756_v20  ;;  %v784_v32 = vmul.f32 %v775_v31, %v760_v10 }
 0x189   : > { %v798_v11 = vmul.f32 %v2009_v47, %v783_v40  ;;  %v799_v23 = vmul.f32 %v2011_v59, %v784_v32 }
 0x18b   : > { %v806_v55 = vadd.f32 %v798_v11, %v734_v50  ;;  %v807_v33 = vadd.f32 %v799_v23, %v735_v18 }
 0x18c   : > { %1040 = vperm.xlu2 %1316, %v1026_v15  }
 0x18d   : > { %1317 = vset.pattern.permute.xlu1 %v1386_v2  ;;  %v893_v34 = vpop.permute.xlu2 %892  ;;  %v1024_v2 = vld [vmem:[%s2208_s5] sm:$0xff] }
 0x18e   : > { %v2044_v7 = vpop.permute.xlu0 %818  ;;  %1045 = vperm.xlu1 %1317, %v1027_v14   ;;  %v815_v44 = vpop.permute.xlu1 %814 }
 0x18f   : > { %v828_v38 = vsel %vm824_vm7, %v815_v44, %v823_v3  ;;  %v832_v43 = vsel %vm824_vm7, %v823_v3, %v815_v44 }
 0x190   : > { %v855_v8 = vmul.f32 %v847_v61, %v828_v38  ;;  %v856_v9 = vmul.f32 %v847_v61, %v832_v43 }
 0x192   : > { %v870_v17 = vmul.f32 %v2046_v35, %v855_v8  ;;  %v871_v62 = vmul.f32 %v2048_v46, %v856_v9 }
 0x194   : > { %v878_v49 = vadd.f32 %v870_v17, %v806_v55  ;;  %v879_v52 = vadd.f32 %v871_v62, %v807_v33  ;;  %1030 = vperm.xlu2 %1316, %v1024_v2  }
 0x195   : > { %v767_v13 = vpop.permute.xlu2 %766 }
 0x196   : > { %v2062_v26 = vpop.permute.xlu0 %964  ;;  %1080 = vperm.xlu1 %1317, %v1077_v1   ;;  %v843_v63 = vpop.permute.xlu1 %842  ;;  %v779_v21 = vmul.f32 %v767_v13, %v1956_v5  ;;  %v780_v41 = vmul.f32 %v767_v13, %v1961_v16  ;;  %v1217_v16 = vld [vmem:[%s2204_s1 + $0x7] ss:$8 sm:$0x3] }
 0x197   : > { %v853_v50 = vmul.f32 %v843_v63, %v827_v12  ;;  %v854_v18 = vmul.f32 %v843_v63, %v831_v19  ;;  %v2076_v6 = vperm.slane %v1217_v16, 0  ;;  %v2078_v27 = vperm.slane %v1217_v16, 1 }
 0x198   : > { %v794_v58 = vmul.f32 %v2009_v47, %v779_v21  ;;  %v795_v3 = vmul.f32 %v2011_v59, %v780_v41 }
 0x199   : > { %v868_v51 = vmul.f32 %v2046_v35, %v853_v50  ;;  %v869_v20 = vmul.f32 %v2048_v46, %v854_v18 }
 0x19a   : > { %v802_v10 = vadd.f32 %v794_v58, %v1888_v22  ;;  %v803_v45 = vadd.f32 %v795_v3, %v1890_v54  ;;  %v899_v22 = vsel %vm896_vm8, %v2007_v29, %v893_v34  ;;  %v903_v54 = vsel %vm896_vm8, %v893_v34, %v2007_v29 }
 0x19b   : > { %v876_v4 = vadd.f32 %v868_v51, %v804_v48  ;;  %v877_v0 = vadd.f32 %v869_v20, %v805_v57 }
 0x19d   : > { %v809_v30 = vpop.permute.xlu2 %808 }
 0x19e   : > { %v887_v5 = vpop.permute.xlu1 %886  ;;  %v839_v42 = vpop.permute.xlu0 %838 }
 0x1a5   : > { %v817_v12 = vpop.permute.xlu2 %816 }
 0x1a6   : > { %v763_v19 = vpop.permute.xlu1 %762  ;;  %v825_v44 = vsel %vm824_vm7, %v809_v30, %v817_v12  ;;  %v829_v38 = vsel %vm824_vm7, %v817_v12, %v809_v30 }
 0x1a7   : > { %v777_v60 = vmul.f32 %v763_v19, %v1812_v36  ;;  %v778_v53 = vmul.f32 %v763_v19, %v1816_v39  ;;  %v915_v48 = vpop.permute.xlu0 %914 }
 0x1a8   : > { %v925_v57 = vmul.f32 %v915_v48, %v899_v22  ;;  %v926_v61 = vmul.f32 %v915_v48, %v903_v54 }
 0x1a9   : > { %v792_v31 = vmul.f32 %v2009_v47, %v777_v60  ;;  %v793_v40 = vmul.f32 %v2011_v59, %v778_v53  ;;  %v900_v47 = vsel %vm896_vm8, %v887_v5, %v2030_v56  ;;  %v904_v59 = vsel %vm896_vm8, %v2030_v56, %v887_v5 }
 0x1aa   : > { %v940_v32 = vmul.f32 %v2076_v6, %v925_v57  ;;  %v941_v11 = vmul.f32 %v2078_v27, %v926_v61 }
 0x1ab   : > { %v800_v23 = vadd.f32 %v792_v31, %v1797_v24  ;;  %v801_v15 = vadd.f32 %v793_v40, %v1799_v28 }
 0x1ac   : > { %v2094_v29 = vadd.f32 %v940_v32, %v876_v4  ;;  %v2096_v36 = vadd.f32 %v941_v11, %v877_v0 }
 0x1ad   : > { %v2098_v39 = vpop.permute.xlu2 %958 }
 0x1af   : > { %v919_v55 = vpop.permute.xlu1 %918  ;;  %v889_v16 = vpop.permute.xlu0 %888 }
 0x1b0   : > { %v927_v33 = vmul.f32 %v919_v55, %v900_v47  ;;  %v928_v14 = vmul.f32 %v919_v55, %v904_v59 }
 0x1b2   : > { %v942_v24 = vmul.f32 %v2076_v6, %v927_v33  ;;  %v943_v28 = vmul.f32 %v2078_v27, %v928_v14 }
 0x1b4   : > { %v2108_v37 = vadd.f32 %v942_v24, %v878_v49  ;;  %v2110_v34 = vadd.f32 %v943_v28, %v879_v52 }
 0x1b5   : > { %v835_v43 = vpop.permute.xlu2 %834 }
 0x1b6   : > { %v849_v8 = vmul.f32 %v835_v43, %v825_v44  ;;  %v850_v56 = vmul.f32 %v835_v43, %v829_v38 }
 0x1b7   : > { %v811_v9 = vpop.permute.xlu1 %810 }
 0x1b8   : > { %v864_v2 = vmul.f32 %v2046_v35, %v849_v8  ;;  %v865_v17 = vmul.f32 %v2048_v46, %v850_v56  ;;  %v826_v62 = vsel %vm824_vm7, %v811_v9, %v2044_v7  ;;  %v830_v1 = vsel %vm824_vm7, %v2044_v7, %v811_v9 }
 0x1b9   : > { %v851_v49 = vmul.f32 %v839_v42, %v826_v62  ;;  %v852_v52 = vmul.f32 %v839_v42, %v830_v1  ;;  %v911_v42 = vpop.permute.xlu0 %910 }
 0x1ba   : > { %v872_v13 = vadd.f32 %v864_v2, %v800_v23  ;;  %v873_v63 = vadd.f32 %v865_v17, %v801_v15 }
 0x1bb   : > { %v866_v21 = vmul.f32 %v2046_v35, %v851_v49  ;;  %v867_v41 = vmul.f32 %v2048_v46, %v852_v52 }
 0x1bd   : > { %v874_v50 = vadd.f32 %v866_v21, %v802_v10  ;;  %v875_v18 = vadd.f32 %v867_v41, %v803_v45  ;;  %v1218_v10 = vld [vmem:[%s2204_s1 + $0x10] ss:$8 sm:$0x3] }
 0x1be   : > { %v991_v58 = vpop.permute.xlu2 %990  ;;  %v1004_v48 = vperm.slane %v1218_v10, 0  ;;  %v1005_v57 = vperm.slane %v1218_v10, 1 }
 0x1bf   : > { %v957_v3 = vpop.permute.xlu1 %956 }
 0x1c0   : > { %v971_v33 = vsel %vm968_vm9, %v957_v3, %v2062_v26  ;;  %v975_v14 = vsel %vm968_vm9, %v2062_v26, %v957_v3 }
 0x1c1   : > { %v979_v53 = vpop.permute.xlu0 %978 }
 0x1c6   : > { %v883_v20 = vpop.permute.xlu2 %882 }
 0x1c7   : > { %v967_v51 = vpop.permute.xlu1 %966 }
 0x1c8   : > { %v972_v24 = vsel %vm968_vm9, %v2098_v39, %v967_v51  ;;  %v976_v28 = vsel %vm968_vm9, %v967_v51, %v2098_v39 }
 0x1c9   : > { %v999_v62 = vmul.f32 %v991_v58, %v972_v24  ;;  %v1000_v26 = vmul.f32 %v991_v58, %v976_v28  ;;  %v1072_v24 = vld [vmem:[%s2209_s6] sm:$0xf] }
 0x1ce   : > { %v907_v0 = vpop.permute.xlu2 %906 }
 0x1cf   : > { %v987_v4 = vpop.permute.xlu1 %986 }
 0x1d0   : > { %v997_v44 = vmul.f32 %v987_v4, %v971_v33  ;;  %v998_v38 = vmul.f32 %v987_v4, %v975_v14 }
 0x1d2   : > { %v1012_v52 = vmul.f32 %v1004_v48, %v997_v44  ;;  %v1013_v21 = vmul.f32 %v1005_v57, %v998_v38 }
 0x1d6   : > { %v955_v5 = vpop.permute.xlu2 %954 }
 0x1d7   : > { %v881_v30 = vpop.permute.xlu1 %880 }
 0x1d8   : > { %v897_v35 = vsel %vm896_vm8, %v881_v30, %v889_v16  ;;  %v901_v46 = vsel %vm896_vm8, %v889_v16, %v881_v30  ;;  %v1014_v30 = vmul.f32 %v1004_v48, %v999_v62  ;;  %v1015_v16 = vmul.f32 %v1005_v57, %v1000_v26 }
 0x1d9   : > { %v921_v45 = vmul.f32 %v907_v0, %v897_v35  ;;  %v922_v22 = vmul.f32 %v907_v0, %v901_v46 }
 0x1db   : > { %v936_v40 = vmul.f32 %v2076_v6, %v921_v45  ;;  %v937_v32 = vmul.f32 %v2078_v27, %v922_v22  ;;  %v1023_v22 = vadd.f32 %v1015_v16, %v2110_v34 }
 0x1dd   : > { %v945_v56 = vadd.f32 %v937_v32, %v873_v63  ;;  %v944_v9 = vadd.f32 %v936_v40, %v872_v13 }
 0x1de   : > { %v963_v12 = vpop.permute.xlu2 %962 }
 0x1df   : > { %v891_v7 = vpop.permute.xlu1 %890  ;;  %v970_v41 = vsel %vm968_vm9, %v955_v5, %v963_v12  ;;  %v974_v39 = vsel %vm968_vm9, %v963_v12, %v955_v5 }
 0x1e0   : > { %v898_v54 = vsel %vm896_vm8, %v883_v20, %v891_v7  ;;  %v902_v60 = vsel %vm896_vm8, %v891_v7, %v883_v20  ;;  %v1020_v7 = vadd.f32 %v1012_v52, %v2094_v29 }
 0x1e1   : > { %v923_v15 = vmul.f32 %v911_v42, %v898_v54  ;;  %v924_v47 = vmul.f32 %v911_v42, %v902_v60  ;;  %v1021_v42 = vadd.f32 %v1013_v21, %v2096_v36 }
 0x1e3   : > { %v938_v2 = vmul.f32 %v2076_v6, %v923_v15  ;;  %v939_v17 = vmul.f32 %v2078_v27, %v924_v47 }
 0x1e5   : > { %v946_v20 = vadd.f32 %v938_v2, %v874_v50  ;;  %v947_v6 = vadd.f32 %v939_v17, %v875_v18  ;;  %v1022_v18 = vadd.f32 %v1014_v30, %v2108_v37  ;;  %v1320_v2 = vld [vmem:[%s1516_s10 + $0x8] sm:$0xff] }
 0x1e6   : > { %v1041_v61 = vpop.permute.xlu2 %1040 }
 0x1e7   : > { %v953_v19 = vpop.permute.xlu1 %952  ;;  %v1052_v5 = vadd.f32 %v1041_v61, %v1020_v7  ;;  %v1053_v12 = vadd.f32 %v1041_v61, %v1021_v42 }
 0x1e9   : > { %v1061_v29 = vmax.f32 %v1053_v12, 0.0 }
 0x1eb   : > { %v1069_v34 = vmin.f32 %v1061_v29, 6.0 }
 0x1ee   : > { %v1031_v3 = vpop.permute.xlu2 %1030 }
 0x1ef   : > { %v961_v31 = vpop.permute.xlu1 %960 }
 0x1f0   : > { %v969_v11 = vsel %vm968_vm9, %v953_v19, %v961_v31  ;;  %v973_v23 = vsel %vm968_vm9, %v961_v31, %v953_v19  ;;  %v1036_v19 = vpop.permute.xlu0 %1035 }
 0x1f1   : > { %v993_v59 = vmul.f32 %v979_v53, %v969_v11  ;;  %v994_v55 = vmul.f32 %v979_v53, %v973_v23 }
 0x1f3   : > { %v1008_v43 = vmul.f32 %v1004_v48, %v993_v59  ;;  %v1009_v8 = vmul.f32 %v1005_v57, %v994_v55 }
 0x1f5   : > { %v1017_v1 = vadd.f32 %v1009_v8, %v945_v56  ;;  %v1016_v49 = vadd.f32 %v1008_v43, %v944_v9  ;;  %v1319_v56 = vld [vmem:[%s1516_s10] sm:$0xff] }
 0x1f7   : > { %v983_v51 = vpop.permute.xlu1 %982  ;;  %v1048_v4 = vadd.f32 %v1031_v3, %v1016_v49  ;;  %v1049_v27 = vadd.f32 %v1031_v3, %v1017_v1 }
 0x1f8   : > { %v995_v63 = vmul.f32 %v983_v51, %v970_v41  ;;  %v996_v13 = vmul.f32 %v983_v51, %v974_v39 }
 0x1f9   : > { %v1056_v46 = vmax.f32 %v1048_v4, 0.0  ;;  %v1057_v10 = vmax.f32 %v1049_v27, 0.0 }
 0x1fa   : > { %v1010_v0 = vmul.f32 %v1004_v48, %v995_v63  ;;  %v1011_v58 = vmul.f32 %v1005_v57, %v996_v13  ;;  %v1060_v48 = vmax.f32 %v1052_v5, 0.0 }
 0x1fb   : > { %v1064_v31 = vmin.f32 %v1056_v46, 6.0  ;;  %v1065_v40 = vmin.f32 %v1057_v10, 6.0 }
 0x1fc   : > { %v1018_v35 = vadd.f32 %v1010_v0, %v946_v20  ;;  %v1019_v25 = vadd.f32 %v1011_v58, %v947_v6  ;;  %v1068_v59 = vmin.f32 %v1060_v48, 6.0 }
 0x1fe   : > { %v1050_v45 = vadd.f32 %v1036_v19, %v1018_v35  ;;  %v1051_v50 = vadd.f32 %v1036_v19, %v1019_v25 }
 0x200   : > { %v1058_v54 = vmax.f32 %v1050_v45, 0.0  ;;  %v1059_v60 = vmax.f32 %v1051_v50, 0.0  ;;  %v1046_v53 = vpop.permute.xlu1 %1045 }
 0x201   : > { %v1054_v57 = vadd.f32 %v1046_v53, %v1022_v18  ;;  %v1055_v36 = vadd.f32 %v1046_v53, %v1023_v22 }
 0x202   : > { %v1066_v32 = vmin.f32 %v1058_v54, 6.0  ;;  %v1067_v11 = vmin.f32 %v1059_v60, 6.0 }
 0x203   : > { %v1062_v61 = vmax.f32 %v1054_v57, 0.0  ;;  %v1063_v23 = vmax.f32 %v1055_v36, 0.0 }
 0x204   : > { %v1073_v15 = vpack.c.bf16 %v1066_v32, %v1064_v31  ;;  %v1074_v47 = vpack.c.bf16 %v1067_v11, %v1065_v40 }
 0x205   : > { %v1070_v37 = vmin.f32 %v1062_v61, 6.0  ;;  %v1071_v55 = vmin.f32 %v1063_v23, 6.0 }
 0x207   : > { %v1075_v33 = vpack.c.bf16 %v1070_v37, %v1068_v59  ;;  %v1076_v14 = vpack.c.bf16 %v1071_v55, %v1069_v34 }
 0x208   : > { %v1081_v28 = vpop.permute.xlu1 %1080 }
 0x209   : > { %1093 = vmatpush.bf16.msra.mxu2 %v1075_v33  ;;  %1106 = vmatpush.bf16.msra.mxu3 %v1076_v14 }
 0x20d   : > { %1094 = vmatpush.bf16.msra.mxu2 %v1073_v15  ;;  %1107 = vmatpush.bf16.msra.mxu3 %v1074_v47 }
 0x210   : > { %1219 = vmatmul.msk.bf16.vlgmr.msra.gmra.mxu2 %vm1083_vm10, %v1072_v24  ;;  %1220 = vmatmul.msk.bf16.vlgmr.msra.gmra.mxu3 %vm1083_vm10, %v1072_v24 }
 0x293   : > { %v1096_v44 = vpop.f32.mrf.mxu2  ;;  %v1109_v38 = vpop.f32.mrf.mxu3 }
 0x294   : > { %v1097_v43 = vadd.f32 %v1096_v44, %v1081_v28  ;;  %v1110_v8 = vadd.f32 %v1109_v38, %v1081_v28 }
 0x296   : > { %v1113_v9 = vadd.f32 %v1319_v56, %v1097_v43  ;;  %v1114_v17 = vadd.f32 %v1320_v2, %v1110_v8 }
 0x298   : > { %1115 = vst [vmem:[%s298_s23] sm:$0xff] %v1113_v9 }
 0x299   : > { %1116 = vst [vmem:[%s298_s23 + $0x8] sm:$0xff] %v1114_v17 }
 0x29a   : > { %1348 = shalt.err (!%p1345_p3)
}
 0x29b   : > { %1230 = dma.vmem_to_hbm [thread:$0]  (%p1485_p5), %s1132_s24, 256, %s1134_s25, %s1118_s9   ;;  %v1098_v62 = vpop.f32.mrf.mxu2  ;;  %v1111_v26 = vpop.f32.mrf.mxu3 }
 0x29c PF: > { %p1236_p4 = scmp.ge.s32.totalorder %s1383_s30, 2  ;;  %s1145_s10 = sand.u32 1, %s1371_s27  }
 0x29d   : > { %s1146_s17 = scalar_lea.sflag [#allocation3], %s1145_s10 }
 0x29e   : > { %p1233_p7 = pnand %p1236_p4, %p1489_p6 }
 0x2a0   : > { %p1234_p8 = pneg %p1233_p7 }
 0x2a2   : > { %1366 = dma.done.wait (%p1234_p8), %s1146_s17, 256  }
 0x2a3   : > { %1368 = vsyncadd (%p1234_p8), %s1146_s17, 4294967040  ;;  %p18_p5 = scmp.ge.s32.totalorder %s1472_s11, 4   ;;  %s2214_s27 = smov %s1375_s28 }
 0x2a4   : > { %s2215_s28 = smov %s1379_s29  ;;  %s2216_s29 = smov %s1483_s14 }
 0x2a5   : > { %s2217_s30 = smov %s1472_s11  ;;  %20 = sbr.rel (!%p18_p5) target bundleno = 3 (0x3), region = 94 }
 0x2aa   :  { %1152 = vsyncpa [#allocation3], 1 }
 0x2ab   :  { %1154 = vsyncpa [#allocation3 + $0x1], 1 }

</bundles_post_ra>
